<compile_context>
chip_gen: v7x
topology: tpu7x:2x2x1
jax: 0.10.0
libtpu: 0.0.40
codegen_flags: <defaults>
</compile_context>

<pallas_src>
import jax
import jax.numpy as jnp
from jax.experimental import pallas as pl
from jax.experimental.pallas import tpu as pltpu


# --------------------------------------------------------------------------
# Kernels
# --------------------------------------------------------------------------
def ffw_kernel_resident(x_ref, w1_ref, b1_ref, w2_ref, b2_ref, o_ref):
    """Whole hidden dim (4C) resident: one (tm,C)@(C,4C) and (tm,4C)@(4C,C)."""
    x = x_ref[...].astype(jnp.bfloat16)                 # no-op if x is already bf16
    h = jnp.dot(x, w1_ref[...], preferred_element_type=jnp.float32)   # (tm, 4C) f32
    h = jnp.maximum(h + b1_ref[...], 0.0)                              # bias + ReLU, f32
    y = jnp.dot(h.astype(jnp.bfloat16), w2_ref[...],
                preferred_element_type=jnp.float32)                    # (tm, C) f32
    o_ref[...] = (y + b2_ref[...]).astype(o_ref.dtype)


def ffw_kernel_hidden_tiled(x_ref, w1_ref, b1_ref, w2_ref, b2_ref, o_ref, acc_ref):
    """Hidden dim tiled along an 'arbitrary' grid axis; f32 accumulator scratch."""
    j = pl.program_id(1)

    @pl.when(j == 0)
    def _init():
        acc_ref[...] = jnp.zeros_like(acc_ref)

    x = x_ref[...].astype(jnp.bfloat16)
    h = jnp.dot(x, w1_ref[...], preferred_element_type=jnp.float32)    # (tm, th)
    h = jnp.maximum(h + b1_ref[...], 0.0)
    acc_ref[...] += jnp.dot(h.astype(jnp.bfloat16), w2_ref[...],
                            preferred_element_type=jnp.float32)        # (tm, C)

    @pl.when(j == pl.num_programs(1) - 1)
    def _finalize():
        o_ref[...] = (acc_ref[...] + b2_ref[...]).astype(o_ref.dtype)


# --------------------------------------------------------------------------
# Policy helpers
# --------------------------------------------------------------------------
def _vmem_limit_bytes():
    """~85% of physical VMEM, capped at 112 MiB (v5e/v6e: ~108 MiB, v7x: ~54 MiB)."""
    try:
        cap = pltpu.get_tpu_info().vmem_capacity_bytes
    except Exception:
        cap = 64 * 1024 * 1024          # conservative fallback, safe on all gens
    return int(min(cap * 0.85, 112 * 1024 * 1024))


def _pick_row_tile(M, tm_max=1024):
    """Row-tile policy (see header): no forced splitting, prefer divisors of M."""
    if M <= tm_max:
        return M                        # single block: no step overhead, no padding
    for step in (256, 16):              # MXU-friendly first, then bf16-packing-friendly
        for tm in range((tm_max // step) * step, step - 1, -step):
            if M % tm == 0:
                return tm
    # Ragged M: minimize padding instead of padding up to a full tm_max tile.
    n = pl.cdiv(M, tm_max)
    return min(tm_max, ((pl.cdiv(M, n) + 15) // 16) * 16)


def _pick_hidden_tile(H, C, tm, in_bytes, out_bytes, vmem_limit):
    """Keep the whole hidden dim resident when it fits the VMEM budget
    (weights stay resident across all row tiles); otherwise tile H."""
    stream = 2 * tm * C * (in_bytes + out_bytes)          # double-buffered x / out tiles
    budget = int(0.75 * vmem_limit)

    def fits(th, resident):
        w = 2 * (2 * C * th) * (1 if resident else 2)     # bf16 W1 + W2 blocks
        hid = tm * th * 4                                 # f32 hidden tile
        acc = 0 if resident else tm * C * 4               # f32 accumulator scratch
        return w + hid + acc + stream <= budget

    if H % 128 != 0 or fits(H, resident=True):
        return H
    for th in range((H // 128) * 128, 127, -128):
        if H % th == 0 and fits(th, resident=False):
            return th
    return 128


# --------------------------------------------------------------------------
# Wrapper
# --------------------------------------------------------------------------
def _call_resident(x2, w1, b1, w2, b2, out_dtype, tm, vmem_limit, single_buffer):
    Mp, C = x2.shape
    H = w1.shape[1]

    def const_spec(shape):
        # Weights/biases are fetched once (constant index_map); single-buffer them.
        if single_buffer:
            return pl.BlockSpec(shape, lambda i: (0, 0), pipeline_mode=pl.Buffered(1))
        return pl.BlockSpec(shape, lambda i: (0, 0))

    return pl.pallas_call(
        ffw_kernel_resident,
        out_shape=jax.ShapeDtypeStruct((Mp, C), out_dtype),
        grid_spec=pltpu.PrefetchScalarGridSpec(
            num_scalar_prefetch=0,
            grid=(Mp // tm,),
            in_specs=[
                pl.BlockSpec((tm, C), lambda i: (i, 0)),   # row tile of x
                const_spec((C, H)),                        # W1 (resident)
                const_spec((1, H)),                        # b1
                const_spec((H, C)),                        # W2 (resident)
                const_spec((1, C)),                        # b2
            ],
            out_specs=pl.BlockSpec((tm, C), lambda i: (i, 0)),
        ),
        compiler_params=pltpu.CompilerParams(
            dimension_semantics=("parallel",),
            vmem_limit_bytes=vmem_limit,
        ),
    )(x2, w1, b1, w2, b2)


def _call_hidden_tiled(x2, w1, b1, w2, b2, out_dtype, tm, th, vmem_limit):
    Mp, C = x2.shape
    H = w1.shape[1]
    return pl.pallas_call(
        ffw_kernel_hidden_tiled,
        out_shape=jax.ShapeDtypeStruct((Mp, C), out_dtype),
        grid_spec=pltpu.PrefetchScalarGridSpec(
            num_scalar_prefetch=0,
            grid=(Mp // tm, H // th),
            in_specs=[
                pl.BlockSpec((tm, C), lambda i, j: (i, 0)),
                pl.BlockSpec((C, th), lambda i, j: (0, j)),
                pl.BlockSpec((1, th), lambda i, j: (0, j)),
                pl.BlockSpec((th, C), lambda i, j: (j, 0)),
                pl.BlockSpec((1, C), lambda i, j: (0, 0)),
            ],
            out_specs=pl.BlockSpec((tm, C), lambda i, j: (i, 0)),
            scratch_shapes=[pltpu.VMEM((tm, C), jnp.float32)],
        ),
        compiler_params=pltpu.CompilerParams(
            dimension_semantics=("parallel", "arbitrary"),
            vmem_limit_bytes=vmem_limit,
        ),
    )(x2, w1, b1, w2, b2)


def feed_forward(x, params, *, tm_max=1024, hidden_block=None):
    """x: (..., C). params: w1 (C,4C), b1 (1,4C) or (4C,), w2 (4C,C), b2 (1,C) or (C,)."""
    orig_shape = x.shape
    C = orig_shape[-1]
    H = params["w1"].shape[-1]

    # bf16 weights: halves resident VMEM / HBM weight traffic, bf16 MXU peak.
    w1 = params["w1"].astype(jnp.bfloat16)
    w2 = params["w2"].astype(jnp.bfloat16)
    b1 = params["b1"].reshape(1, H).astype(jnp.float32)
    b2 = params["b2"].reshape(1, C).astype(jnp.float32)

    x2 = x.reshape(-1, C)                 # no wrapper-side dtype cast: bf16 x streams as bf16
    M = x2.shape[0]
    tm = _pick_row_tile(M, tm_max)
    Mp = pl.cdiv(M, tm) * tm
    if Mp != M:
        # TODO(synk): ragged last tile could use a masked store instead of this
        # pad + slice HBM round trip; only reached when no nice tile divides M.
        x2 = jnp.pad(x2, ((0, Mp - M), (0, 0)))

    vmem_limit = _vmem_limit_bytes()
    if hidden_block is not None:
        assert H % hidden_block == 0 and (hidden_block == H or hidden_block % 128 == 0)
        th = hidden_block
    else:
        th = _pick_hidden_tile(H, C, tm, x2.dtype.itemsize, x.dtype.itemsize, vmem_limit)

    if th == H:
        try:
            out = _call_resident(x2, w1, b1, w2, b2, x.dtype, tm, vmem_limit,
                                 single_buffer=True)
        except Exception:
            # Fallback for jax versions without BlockSpec.pipeline_mode /
            # pl.Buffered(1); identical semantics, default double-buffered weights.
            out = _call_resident(x2, w1, b1, w2, b2, x.dtype, tm, vmem_limit,
                                 single_buffer=False)
    else:
        out = _call_hidden_tiled(x2, w1, b1, w2, b2, x.dtype, tm, th, vmem_limit)

    if Mp != M:
        out = out[:M]
    return out.reshape(orig_shape)


def reference_feed_forward(x, params):
    """Pure-JAX f32 reference (eval-mode dropout = identity)."""
    h = jnp.maximum(x @ params["w1"] + params["b1"], 0.0)
    return h @ params["w2"] + params["b2"]


# --------------------------------------------------------------------------
# Demo / self-test
# --------------------------------------------------------------------------
if __name__ == "__main__":
    def make_params(key, n_embd):
        hidden = 4 * n_embd
        k1, k2, k3, k4 = jax.random.split(key, 4)
        return {
            # (in, out) layout so y = x @ W + b (PyTorch stores (out,in), uses x @ W.T).
            "w1": 0.1 * jax.random.normal(k1, (n_embd, hidden), jnp.float32),
            "b1": 0.1 * jax.random.normal(k2, (1, hidden), jnp.float32),
            "w2": 0.1 * jax.random.normal(k3, (hidden, n_embd), jnp.float32),
            "b2": 0.1 * jax.random.normal(k4, (1, n_embd), jnp.float32),
        }

    key = jax.random.PRNGKey(0)
    kx1, kp1, kx2, kp2 = jax.random.split(key, 4)

    # 1) bigram.py-scale config (resident-hidden path, single grid step).
    B, T, n_embd = 2, 8, 32
    x = jax.random.normal(kx1, (B, T, n_embd), jnp.float32)
    params = make_params(kp1, n_embd)
    out = jax.block_until_ready(feed_forward(x, params))
    ref = reference_feed_forward(x, params)
    assert out.shape == (B, T, n_embd)
    # bf16 matmul operands with f32 accumulation -> relaxed tolerance vs f32 ref.
    assert jnp.allclose(out, ref, atol=5e-2, rtol=5e-2), "mismatch vs reference (resident)"

    # 2) Exercise the hidden-tiled accumulator path (used at production C on
    #    v7x) by forcing hidden_block < 4*n_embd.
    B2, T2, n_embd2 = 4, 16, 64
    x2 = jax.random.normal(kx2, (B2, T2, n_embd2), jnp.float32)
    params2 = make_params(kp2, n_embd2)
    out2 = jax.block_until_ready(feed_forward(x2, params2, hidden_block=128))
    ref2 = reference_feed_forward(x2, params2)
    assert out2.shape == (B2, T2, n_embd2)
    assert jnp.allclose(out2, ref2, atol=5e-2, rtol=5e-2), "mismatch vs reference (H-tiled)"

    print("KERNEL_OK")
</pallas_src>

<mosaic_0001>
module attributes {stable_mosaic.version = 11 : i64} {
  func.func @ffw_kernel_resident(%arg0: i32, %arg1: memref<16x32xf32, #tpu.memory_space<vmem>>, %arg2: memref<32x128xbf16, #tpu.memory_space<vmem>>, %arg3: memref<1x128xf32, #tpu.memory_space<vmem>>, %arg4: memref<128x32xbf16, #tpu.memory_space<vmem>>, %arg5: memref<1x32xf32, #tpu.memory_space<vmem>>, %arg6: memref<16x32xf32, #tpu.memory_space<vmem>>) attributes {dimension_semantics = [#tpu.dimension_semantics<parallel>], iteration_bounds = array<i64: 1>, scalar_prefetch = 0 : i64, scratch_operands = 0 : i64, tpu.core_type = #tpu.core_type<tc>, window_params = [{transform_indices = @transform_0, window_bounds = array<i64: 16, 32>}, {pipeline_mode = #tpu.pipeline_mode<synchronous>, transform_indices = @transform_1, window_bounds = array<i64: 32, 128>}, {pipeline_mode = #tpu.pipeline_mode<synchronous>, transform_indices = @transform_2, window_bounds = array<i64: 1, 128>}, {pipeline_mode = #tpu.pipeline_mode<synchronous>, transform_indices = @transform_3, window_bounds = array<i64: 128, 32>}, {pipeline_mode = #tpu.pipeline_mode<synchronous>, transform_indices = @transform_4, window_bounds = array<i64: 1, 32>}, {transform_indices = @transform_5, window_bounds = array<i64: 16, 32>}]} {
    %c0 = arith.constant 0 : index
    %c0_0 = arith.constant 0 : index
    %0 = vector.load %arg1[%c0, %c0_0] : memref<16x32xf32, #tpu.memory_space<vmem>>, vector<16x32xf32>
    %1 = arith.truncf %0 : vector<16x32xf32> to vector<16x32xbf16>
    %c0_1 = arith.constant 0 : index
    %c0_2 = arith.constant 0 : index
    %2 = vector.load %arg2[%c0_1, %c0_2] : memref<32x128xbf16, #tpu.memory_space<vmem>>, vector<32x128xbf16>
    %cst = arith.constant dense<0.000000e+00> : vector<16x128xf32>
    %3 = tpu.matmul %1, %2, %cst {dimension_numbers = #tpu.dot_dimension_numbers<[1], [0], [0], [1], [0, 0, 1, 1], [], []>} : vector<16x32xbf16>, vector<32x128xbf16>, vector<16x128xf32> -> vector<16x128xf32>
    %c0_3 = arith.constant 0 : index
    %c0_4 = arith.constant 0 : index
    %4 = vector.load %arg3[%c0_3, %c0_4] : memref<1x128xf32, #tpu.memory_space<vmem>>, vector<1x128xf32>
    %5 = vector.broadcast %4 : vector<1x128xf32> to vector<16x128xf32>
    %6 = arith.addf %3, %5 : vector<16x128xf32>
    %cst_5 = arith.constant 0.000000e+00 : f32
    %7 = vector.broadcast %cst_5 : f32 to vector<16x128xf32>
    %8 = arith.maximumf %6, %7 : vector<16x128xf32>
    %9 = arith.truncf %8 : vector<16x128xf32> to vector<16x128xbf16>
    %c0_6 = arith.constant 0 : index
    %c0_7 = arith.constant 0 : index
    %10 = vector.load %arg4[%c0_6, %c0_7] : memref<128x32xbf16, #tpu.memory_space<vmem>>, vector<128x32xbf16>
    %cst_8 = arith.constant dense<0.000000e+00> : vector<16x32xf32>
    %11 = tpu.matmul %9, %10, %cst_8 {dimension_numbers = #tpu.dot_dimension_numbers<[1], [0], [0], [1], [0, 0, 1, 1], [], []>} : vector<16x128xbf16>, vector<128x32xbf16>, vector<16x32xf32> -> vector<16x32xf32>
    %c0_9 = arith.constant 0 : index
    %c0_10 = arith.constant 0 : index
    %12 = vector.load %arg5[%c0_9, %c0_10] : memref<1x32xf32, #tpu.memory_space<vmem>>, vector<1x32xf32>
    %13 = vector.broadcast %12 : vector<1x32xf32> to vector<16x32xf32>
    %14 = arith.addf %11, %13 : vector<16x32xf32>
    %c0_11 = arith.constant 0 : index
    %c0_12 = arith.constant 0 : index
    %15 = vector.load %arg6[%c0_11, %c0_12] : memref<16x32xf32, #tpu.memory_space<vmem>>, vector<16x32xf32>
    tpu.vector_store %arg6[%c0_11, %c0_12], %14 {strides = array<i32>} : memref<16x32xf32, #tpu.memory_space<vmem>>, vector<16x32xf32>,
    return
  }
  func.func @transform_0(%arg0: i32) -> (i32, i32) {
    %c0_i32 = arith.constant 0 : i32
    %c0_i32_0 = arith.constant 0 : i32
    return %arg0, %c0_i32 : i32, i32
  }
  func.func @transform_1(%arg0: i32) -> (i32, i32) {
    %c0_i32 = arith.constant 0 : i32
    %c0_i32_0 = arith.constant 0 : i32
    %c0_i32_1 = arith.constant 0 : i32
    return %c0_i32, %c0_i32_0 : i32, i32
  }
  func.func @transform_2(%arg0: i32) -> (i32, i32) {
    %c0_i32 = arith.constant 0 : i32
    %c0_i32_0 = arith.constant 0 : i32
    %c0_i32_1 = arith.constant 0 : i32
    return %c0_i32, %c0_i32_0 : i32, i32
  }
  func.func @transform_3(%arg0: i32) -> (i32, i32) {
    %c0_i32 = arith.constant 0 : i32
    %c0_i32_0 = arith.constant 0 : i32
    %c0_i32_1 = arith.constant 0 : i32
    return %c0_i32, %c0_i32_0 : i32, i32
  }
  func.func @transform_4(%arg0: i32) -> (i32, i32) {
    %c0_i32 = arith.constant 0 : i32
    %c0_i32_0 = arith.constant 0 : i32
    %c0_i32_1 = arith.constant 0 : i32
    return %c0_i32, %c0_i32_0 : i32, i32
  }
  func.func @transform_5(%arg0: i32) -> (i32, i32) {
    %c0_i32 = arith.constant 0 : i32
    %c0_i32_0 = arith.constant 0 : i32
    return %arg0, %c0_i32 : i32, i32
  }
}

module attributes {stable_mosaic.version = 11 : i64} {
  func.func @ffw_kernel_resident(%arg0: i32, %arg1: memref<16x32xf32, #tpu.memory_space<vmem>>, %arg2: memref<32x128xbf16, #tpu.memory_space<vmem>>, %arg3: memref<1x128xf32, #tpu.memory_space<vmem>>, %arg4: memref<128x32xbf16, #tpu.memory_space<vmem>>, %arg5: memref<1x32xf32, #tpu.memory_space<vmem>>, %arg6: memref<16x32xf32, #tpu.memory_space<vmem>>) attributes {dimension_semantics = [#tpu.dimension_semantics<parallel>], iteration_bounds = array<i64: 1>, scalar_prefetch = 0 : i64, scratch_operands = 0 : i64, tpu.core_type = #tpu.core_type<tc>, window_params = [{transform_indices = @transform_0, window_bounds = array<i64: 16, 32>}, {pipeline_mode = #tpu.pipeline_mode<synchronous>, transform_indices = @transform_1, window_bounds = array<i64: 32, 128>}, {pipeline_mode = #tpu.pipeline_mode<synchronous>, transform_indices = @transform_2, window_bounds = array<i64: 1, 128>}, {pipeline_mode = #tpu.pipeline_mode<synchronous>, transform_indices = @transform_3, window_bounds = array<i64: 128, 32>}, {pipeline_mode = #tpu.pipeline_mode<synchronous>, transform_indices = @transform_4, window_bounds = array<i64: 1, 32>}, {transform_indices = @transform_5, window_bounds = array<i64: 16, 32>}]} {
    %c0 = arith.constant 0 : index
    %c0_0 = arith.constant 0 : index
    %0 = vector.load %arg1[%c0, %c0_0] : memref<16x32xf32, #tpu.memory_space<vmem>>, vector<16x32xf32>
    %1 = arith.truncf %0 : vector<16x32xf32> to vector<16x32xbf16>
    %c0_1 = arith.constant 0 : index
    %c0_2 = arith.constant 0 : index
    %2 = vector.load %arg2[%c0_1, %c0_2] : memref<32x128xbf16, #tpu.memory_space<vmem>>, vector<32x128xbf16>
    %cst = arith.constant dense<0.000000e+00> : vector<16x128xf32>
    %3 = tpu.matmul %1, %2, %cst {dimension_numbers = #tpu.dot_dimension_numbers<[1], [0], [0], [1], [0, 0, 1, 1], [], []>} : vector<16x32xbf16>, vector<32x128xbf16>, vector<16x128xf32> -> vector<16x128xf32>
    %c0_3 = arith.constant 0 : index
    %c0_4 = arith.constant 0 : index
    %4 = vector.load %arg3[%c0_3, %c0_4] : memref<1x128xf32, #tpu.memory_space<vmem>>, vector<1x128xf32>
    %5 = vector.broadcast %4 : vector<1x128xf32> to vector<16x128xf32>
    %6 = arith.addf %3, %5 : vector<16x128xf32>
    %cst_5 = arith.constant 0.000000e+00 : f32
    %7 = vector.broadcast %cst_5 : f32 to vector<16x128xf32>
    %8 = arith.maximumf %6, %7 : vector<16x128xf32>
    %9 = arith.truncf %8 : vector<16x128xf32> to vector<16x128xbf16>
    %c0_6 = arith.constant 0 : index
    %c0_7 = arith.constant 0 : index
    %10 = vector.load %arg4[%c0_6, %c0_7] : memref<128x32xbf16, #tpu.memory_space<vmem>>, vector<128x32xbf16>
    %cst_8 = arith.constant dense<0.000000e+00> : vector<16x32xf32>
    %11 = tpu.matmul %9, %10, %cst_8 {dimension_numbers = #tpu.dot_dimension_numbers<[1], [0], [0], [1], [0, 0, 1, 1], [], []>} : vector<16x128xbf16>, vector<128x32xbf16>, vector<16x32xf32> -> vector<16x32xf32>
    %c0_9 = arith.constant 0 : index
    %c0_10 = arith.constant 0 : index
    %12 = vector.load %arg5[%c0_9, %c0_10] : memref<1x32xf32, #tpu.memory_space<vmem>>, vector<1x32xf32>
    %13 = vector.broadcast %12 : vector<1x32xf32> to vector<16x32xf32>
    %14 = arith.addf %11, %13 : vector<16x32xf32>
    %c0_11 = arith.constant 0 : index
    %c0_12 = arith.constant 0 : index
    %15 = vector.load %arg6[%c0_11, %c0_12] : memref<16x32xf32, #tpu.memory_space<vmem>>, vector<16x32xf32>
    tpu.vector_store %arg6[%c0_11, %c0_12], %14 {strides = array<i32>} : memref<16x32xf32, #tpu.memory_space<vmem>>, vector<16x32xf32>,
    return
  }
  func.func @transform_0(%arg0: i32) -> (i32, i32) {
    %c0_i32 = arith.constant 0 : i32
    %c0_i32_0 = arith.constant 0 : i32
    return %arg0, %c0_i32 : i32, i32
  }
  func.func @transform_1(%arg0: i32) -> (i32, i32) {
    %c0_i32 = arith.constant 0 : i32
    %c0_i32_0 = arith.constant 0 : i32
    %c0_i32_1 = arith.constant 0 : i32
    return %c0_i32, %c0_i32_0 : i32, i32
  }
  func.func @transform_2(%arg0: i32) -> (i32, i32) {
    %c0_i32 = arith.constant 0 : i32
    %c0_i32_0 = arith.constant 0 : i32
    %c0_i32_1 = arith.constant 0 : i32
    return %c0_i32, %c0_i32_0 : i32, i32
  }
  func.func @transform_3(%arg0: i32) -> (i32, i32) {
    %c0_i32 = arith.constant 0 : i32
    %c0_i32_0 = arith.constant 0 : i32
    %c0_i32_1 = arith.constant 0 : i32
    return %c0_i32, %c0_i32_0 : i32, i32
  }
  func.func @transform_4(%arg0: i32) -> (i32, i32) {
    %c0_i32 = arith.constant 0 : i32
    %c0_i32_0 = arith.constant 0 : i32
    %c0_i32_1 = arith.constant 0 : i32
    return %c0_i32, %c0_i32_0 : i32, i32
  }
  func.func @transform_5(%arg0: i32) -> (i32, i32) {
    %c0_i32 = arith.constant 0 : i32
    %c0_i32_0 = arith.constant 0 : i32
    return %arg0, %c0_i32 : i32, i32
  }
}

</mosaic_0001>

<bundles_post_ra>
// kernel: tpu_custom_call.1
= control target key start
LH: loop header
LB: loop body
LE: loop exit
PB: predicated region body
PF: predicated region fallthrough
CT: control target
= control target key end

     0   :  { %v318_v1 = vmov 0.0   ;;  %vm319_vm0 = vmmov 0   ;;  %vm48_vm1 = vcmask 261120   ;;  %s410_s0 = inlined_call_operand.vmem [shape: f32[16,32], index: 0, kind: input, shape index: {}]   ;;  %s411_s1 = inlined_call_operand.vmem [shape: bf16[32,128], index: 1, kind: input, shape index: {}]   ;;  %s412_s2 = inlined_call_operand.vmem [shape: f32[1,128], index: 2, kind: input, shape index: {}]   ;;  %s413_s3 = inlined_call_operand.vmem [shape: bf16[128,32], index: 3, kind: input, shape index: {}]   ;;  %s414_s4 = inlined_call_operand.vmem [shape: f32[1,32], index: 4, kind: input, shape index: {}]   ;;  %s415_s5 = inlined_call_operand.hbm [shape: f32[16,32], index: 5, kind: output, shape index: {}]  }
   0x1   :  { %v284_v0 = vld [vmem:[%s411_s1] sm:$0xff]   ;;  %251 = vmatprep.subr.bf16.mxu0 %v318_v1  ;;  %v285_v2 = vld [vmem:[%s411_s1 + $0x8] sm:$0xff]   ;;  %259 = vmatprep.subr.bf16.mxu1 %v318_v1  ;;  %v288_v8 = vld [vmem:[%s413_s3 + $0x10] sm:$0xff]  }
   0x2   :  { %252 = vmatpush3.bf16.msra.mxu0 %v284_v0  ;;  %255 = vmatprep.mubr.msk.bf16.mxu0 %vm319_vm0, %v318_v1  ;;  %v22_v3 = vld [vmem:[%s410_s0] sm:$0xff]  ;;  %v23_v4 = vld [vmem:[%s410_s0 + $0x8] sm:$0xff] }
   0x3   :  { %253 = vmatprep.subr.bf16.mxu0 %v318_v1  ;;  %v286_v5 = vld [vmem:[%s413_s3] sm:$0xff]   ;;  %275 = vmatprep.mubr.msk.bf16.mxu1 %vm319_vm0, %v318_v1  ;;  %v24_v6 = vpack.c.bf16 %v23_v4, %v22_v3  ;;  %v287_v7 = vld [vmem:[%s413_s3 + $0x8] sm:$0xff]  }
   0x4   :  { %260 = vmatpush3.bf16.msra.mxu1 %v286_v5 }
   0x5   :  { %261 = vmatprep.subr.bf16.mxu1 %v318_v1 }
   0x6   :  { %254 = vmatpush3.bf16.msra.mxu0 %v285_v2 }
   0x8   :  { %262 = vmatpush3.bf16.msra.mxu1 %v287_v7 }
   0x9   :  { %256 = vmatmul.mubr.msk.bf16.vlgmr.msra.gmra.mrb[0].mxu0 %vm48_vm1, %v24_v6  ;;  %263 = vmatprep.subr.bf16.mxu1 %v318_v1 }
   0xa   :  { %10 = vsyncpa [#allocation3], 0  ;;  %v289_v9 = vld [vmem:[%s413_s3 + $0x18] sm:$0xff]   ;;  %v290_v10 = vld [vmem:[%s413_s3 + $0x20] sm:$0xff]  }
   0xb   :  { %v291_v11 = vld [vmem:[%s413_s3 + $0x28] sm:$0xff]   ;;  %v292_v12 = vld [vmem:[%s413_s3 + $0x30] sm:$0xff]   ;;  %v293_v13 = vld [vmem:[%s413_s3 + $0x38] sm:$0xff]   ;;  %s320_s3 = smov [#allocation2]  }
   0xc   :  { %264 = vmatpush3.bf16.msra.mxu1 %v288_v8  ;;  %v226_v14 = vld [vmem:[%s412_s2] ss:$0 sm:$0xff]  ;;  %s215_s19 = sshll.u32 %s320_s3, 4  ;;  %s216_s19 = int_to_ptr.vmem [resolvable:$true] %s215_s19 }
   0xd   :  { %265 = vmatprep.subr.bf16.mxu1 %v318_v1  ;;  %v230_v24 = vld [vmem:[%s414_s4] ss:$0 sm:$0xff]  ;;  %s294_s2 = scalar_lea.vmem %s216_s19, 256  ;;  %p299_p1 = scmp.lt.s32.totalorder %s216_s19, %s216_s19 }
   0xe   :  { %p295_p0 = scmp.ne.s32.totalorder %s216_s19, %s294_s2  ;;  %p300_p2 = scmp.lt.s32.totalorder %s294_s2, %s294_s2 }
  0x10   :  { %266 = vmatpush3.bf16.msra.mxu1 %v289_v9  ;;  %p301_p3 = por %p300_p2, %p299_p1 }
  0x11   :  { %267 = vmatprep.subr.bf16.mxu1 %v318_v1 }
  0x12   :  { %p302_p4 = pnand %p301_p3, %p295_p0 }
  0x14   :  { %268 = vmatpush3.bf16.msra.mxu1 %v290_v10 }
  0x15   :  { %269 = vmatprep.subr.bf16.mxu1 %v318_v1 }
  0x18   :  { %270 = vmatpush3.bf16.msra.mxu1 %v291_v11 }
  0x19   :  { %271 = vmatprep.subr.bf16.mxu1 %v318_v1 }
  0x1c   :  { %272 = vmatpush3.bf16.msra.mxu1 %v292_v12 }
  0x1d   :  { %273 = vmatprep.subr.bf16.mxu1 %v318_v1 }
  0x20   :  { %274 = vmatpush3.bf16.msra.mxu1 %v293_v13 }
  0xdc   :  { %v86_v15 = vpop.f32.mrb[0].mxu0 }
  0xdd   :  { %v87_v16 = vadd.f32 %v226_v14, %v86_v15  ;;  %v257_v17 = vpop.f32.mrb[1].mxu0 }
  0xde   :  { %v89_v18 = vpop.f32.mrb[2].mxu0 }
  0xdf   :  { %v90_v19 = vadd.f32 %v226_v14, %v89_v18  ;;  %v258_v20 = vpop.f32.mrb[3].mxu0  ;;  %v93_v21 = vmax.f32 %v87_v16, 0.0 }
  0xe1   :  { %v94_v22 = vmax.f32 %v90_v19, 0.0 }
  0xe3   :  { %v95_v23 = vpack.c.bf16 %v94_v22, %v93_v21 }
  0xe5   :  { %276 = vmatmul.mubr.bf16.vlgmr.msra.gmra.mrb[0].mxu1 %v95_v23 }
 0x1b8   :  { %v201_v25 = vpop.f32.mrb[0].mxu1 }
 0x1b9   :  { %v202_v26 = vadd.f32 %v230_v24, %v201_v25  ;;  %v277_v27 = vpop.f32.mrb[1].mxu1 }
 0x1ba   :  { %v204_v28 = vpop.f32.mrb[2].mxu1 }
 0x1bb   :  { %208 = vst.msk [vmem:[#allocation2] sm:$0xff] %vm48_vm1, %v202_v26  ;;  %v205_v29 = vadd.f32 %v230_v24, %v204_v28  ;;  %v278_v30 = vpop.f32.mrb[3].mxu1 }
 0x1bd   :  { %209 = vst.msk [vmem:[#allocation2 + $0x8] sm:$0xff] %vm48_vm1, %v205_v29 }
 0x1be   :  { %305 = shalt.err (!%p302_p4)
}
 0x1bf   :  { %s306_s21 = scalar_lea.hbm %s415_s5, 256 }
 0x1c0   :  { %p307_p5 = scmp.ne.s32.totalorder %s415_s5, %s306_s21  ;;  %p310_p6 = scmp.lt.u32.totalorder %s306_s21, %s415_s5 }
 0x1c2   :  { %p312_p7 = pnand %p310_p6, %p307_p5 }
 0x1c4   :  { %315 = shalt.err (!%p312_p7)
}
 0x1c5   :  { %s321_s26 = smov 128   ;;  %s322_s27 = smov 8  }
 0x1c6   :  { %221 = dma.vmem_to_hbm [thread:$0]  %s216_s19, 256, %s415_s5, [#allocation3], %s321_s26, %s321_s26, %s322_s27  }
 0x1c7   :  { %316 = dma.done.wait [#allocation3], 256  }
 0x1c8   :  { %317 = vsyncadd [#allocation3], 4294967040 }
 0x1c9   :  { %225 = vsyncpa [#allocation3], 1 }

// kernel: tpu_custom_call.1
= control target key start
LH: loop header
LB: loop body
LE: loop exit
PB: predicated region body
PF: predicated region fallthrough
CT: control target
= control target key end

     0   :  { %v318_v1 = vmov 0.0   ;;  %vm319_vm0 = vmmov 0   ;;  %vm48_vm1 = vcmask 261120   ;;  %s410_s0 = inlined_call_operand.vmem [shape: f32[16,32], index: 0, kind: input, shape index: {}]   ;;  %s411_s1 = inlined_call_operand.vmem [shape: bf16[32,128], index: 1, kind: input, shape index: {}]   ;;  %s412_s2 = inlined_call_operand.vmem [shape: f32[1,128], index: 2, kind: input, shape index: {}]   ;;  %s413_s3 = inlined_call_operand.vmem [shape: bf16[128,32], index: 3, kind: input, shape index: {}]   ;;  %s414_s4 = inlined_call_operand.vmem [shape: f32[1,32], index: 4, kind: input, shape index: {}]   ;;  %s415_s5 = inlined_call_operand.hbm [shape: f32[16,32], index: 5, kind: output, shape index: {}]  }
   0x1   :  { %v284_v0 = vld [vmem:[%s411_s1] sm:$0xff]   ;;  %251 = vmatprep.subr.bf16.mxu0 %v318_v1  ;;  %v285_v2 = vld [vmem:[%s411_s1 + $0x8] sm:$0xff]   ;;  %259 = vmatprep.subr.bf16.mxu1 %v318_v1  ;;  %v288_v8 = vld [vmem:[%s413_s3 + $0x10] sm:$0xff]  }
   0x2   :  { %252 = vmatpush3.bf16.msra.mxu0 %v284_v0  ;;  %255 = vmatprep.mubr.msk.bf16.mxu0 %vm319_vm0, %v318_v1  ;;  %v22_v3 = vld [vmem:[%s410_s0] sm:$0xff]  ;;  %v23_v4 = vld [vmem:[%s410_s0 + $0x8] sm:$0xff] }
   0x3   :  { %253 = vmatprep.subr.bf16.mxu0 %v318_v1  ;;  %v286_v5 = vld [vmem:[%s413_s3] sm:$0xff]   ;;  %275 = vmatprep.mubr.msk.bf16.mxu1 %vm319_vm0, %v318_v1  ;;  %v24_v6 = vpack.c.bf16 %v23_v4, %v22_v3  ;;  %v287_v7 = vld [vmem:[%s413_s3 + $0x8] sm:$0xff]  }
   0x4   :  { %260 = vmatpush3.bf16.msra.mxu1 %v286_v5 }
   0x5   :  { %261 = vmatprep.subr.bf16.mxu1 %v318_v1 }
   0x6   :  { %254 = vmatpush3.bf16.msra.mxu0 %v285_v2 }
   0x8   :  { %262 = vmatpush3.bf16.msra.mxu1 %v287_v7 }
   0x9   :  { %256 = vmatmul.mubr.msk.bf16.vlgmr.msra.gmra.mrb[0].mxu0 %vm48_vm1, %v24_v6  ;;  %263 = vmatprep.subr.bf16.mxu1 %v318_v1 }
   0xa   :  { %10 = vsyncpa [#allocation3], 0  ;;  %v289_v9 = vld [vmem:[%s413_s3 + $0x18] sm:$0xff]   ;;  %v290_v10 = vld [vmem:[%s413_s3 + $0x20] sm:$0xff]  }
   0xb   :  { %v291_v11 = vld [vmem:[%s413_s3 + $0x28] sm:$0xff]   ;;  %v292_v12 = vld [vmem:[%s413_s3 + $0x30] sm:$0xff]   ;;  %v293_v13 = vld [vmem:[%s413_s3 + $0x38] sm:$0xff]   ;;  %s320_s3 = smov [#allocation2]  }
   0xc   :  { %264 = vmatpush3.bf16.msra.mxu1 %v288_v8  ;;  %v226_v14 = vld [vmem:[%s412_s2] ss:$0 sm:$0xff]  ;;  %s215_s19 = sshll.u32 %s320_s3, 4  ;;  %s216_s19 = int_to_ptr.vmem [resolvable:$true] %s215_s19 }
   0xd   :  { %265 = vmatprep.subr.bf16.mxu1 %v318_v1  ;;  %v230_v24 = vld [vmem:[%s414_s4] ss:$0 sm:$0xff]  ;;  %s294_s2 = scalar_lea.vmem %s216_s19, 256  ;;  %p299_p1 = scmp.lt.s32.totalorder %s216_s19, %s216_s19 }
   0xe   :  { %p295_p0 = scmp.ne.s32.totalorder %s216_s19, %s294_s2  ;;  %p300_p2 = scmp.lt.s32.totalorder %s294_s2, %s294_s2 }
  0x10   :  { %266 = vmatpush3.bf16.msra.mxu1 %v289_v9  ;;  %p301_p3 = por %p300_p2, %p299_p1 }
  0x11   :  { %267 = vmatprep.subr.bf16.mxu1 %v318_v1 }
  0x12   :  { %p302_p4 = pnand %p301_p3, %p295_p0 }
  0x14   :  { %268 = vmatpush3.bf16.msra.mxu1 %v290_v10 }
  0x15   :  { %269 = vmatprep.subr.bf16.mxu1 %v318_v1 }
  0x18   :  { %270 = vmatpush3.bf16.msra.mxu1 %v291_v11 }
  0x19   :  { %271 = vmatprep.subr.bf16.mxu1 %v318_v1 }
  0x1c   :  { %272 = vmatpush3.bf16.msra.mxu1 %v292_v12 }
  0x1d   :  { %273 = vmatprep.subr.bf16.mxu1 %v318_v1 }
  0x20   :  { %274 = vmatpush3.bf16.msra.mxu1 %v293_v13 }
  0xdc   :  { %v86_v15 = vpop.f32.mrb[0].mxu0 }
  0xdd   :  { %v87_v16 = vadd.f32 %v226_v14, %v86_v15  ;;  %v257_v17 = vpop.f32.mrb[1].mxu0 }
  0xde   :  { %v89_v18 = vpop.f32.mrb[2].mxu0 }
  0xdf   :  { %v90_v19 = vadd.f32 %v226_v14, %v89_v18  ;;  %v258_v20 = vpop.f32.mrb[3].mxu0  ;;  %v93_v21 = vmax.f32 %v87_v16, 0.0 }
  0xe1   :  { %v94_v22 = vmax.f32 %v90_v19, 0.0 }
  0xe3   :  { %v95_v23 = vpack.c.bf16 %v94_v22, %v93_v21 }
  0xe5   :  { %276 = vmatmul.mubr.bf16.vlgmr.msra.gmra.mrb[0].mxu1 %v95_v23 }
 0x1b8   :  { %v201_v25 = vpop.f32.mrb[0].mxu1 }
 0x1b9   :  { %v202_v26 = vadd.f32 %v230_v24, %v201_v25  ;;  %v277_v27 = vpop.f32.mrb[1].mxu1 }
 0x1ba   :  { %v204_v28 = vpop.f32.mrb[2].mxu1 }
 0x1bb   :  { %208 = vst.msk [vmem:[#allocation2] sm:$0xff] %vm48_vm1, %v202_v26  ;;  %v205_v29 = vadd.f32 %v230_v24, %v204_v28  ;;  %v278_v30 = vpop.f32.mrb[3].mxu1 }
 0x1bd   :  { %209 = vst.msk [vmem:[#allocation2 + $0x8] sm:$0xff] %vm48_vm1, %v205_v29 }
 0x1be   :  { %305 = shalt.err (!%p302_p4)
}
 0x1bf   :  { %s306_s21 = scalar_lea.hbm %s415_s5, 256 }
 0x1c0   :  { %p307_p5 = scmp.ne.s32.totalorder %s415_s5, %s306_s21  ;;  %p310_p6 = scmp.lt.u32.totalorder %s306_s21, %s415_s5 }
 0x1c2   :  { %p312_p7 = pnand %p310_p6, %p307_p5 }
 0x1c4   :  { %315 = shalt.err (!%p312_p7)
}
 0x1c5   :  { %s321_s26 = smov 128   ;;  %s322_s27 = smov 8  }
 0x1c6   :  { %221 = dma.vmem_to_hbm [thread:$0]  %s216_s19, 256, %s415_s5, [#allocation3], %s321_s26, %s321_s26, %s322_s27  }
 0x1c7   :  { %316 = dma.done.wait [#allocation3], 256  }
 0x1c8   :  { %317 = vsyncadd [#allocation3], 4294967040 }
 0x1c9   :  { %225 = vsyncpa [#allocation3], 1 }

</bundles_post_ra>
